<compile_context>
chip_gen: v7x
topology: tpu7x:2x2x1
jax: 0.10.0
libtpu: 0.0.40
codegen_flags: <defaults>
</compile_context>

<pallas_src>
import functools

import jax
import jax.numpy as jnp
from jax.experimental import pallas as pl
from jax.experimental.pallas import tpu as pltpu

HIDDEN = 25          # real hidden width of fc1
OUT = 3              # real number of classes
H_PAD = 128          # hidden width padded to one full lane tile
OUT_PAD = 128        # lane-dense output width


def _round_up(n, m):
    return (n + m - 1) // m * m


def mlp_kernel(x_ref, w1_ref, b1_ref, w2_ref, b2_ref, o_ref, *, num_classes):
    # fc1 + ReLU  (f32 MXU accumulation)
    x = x_ref[...]
    h = jnp.dot(x, w1_ref[...], preferred_element_type=jnp.float32) + b1_ref[...]
    h = jnp.maximum(h, 0.0)

    # fc2 -> (TB, OUT_PAD) padded logits
    logits = jnp.dot(h, w2_ref[...], preferred_element_type=jnp.float32) + b2_ref[...]

    # Mask padded class lanes so they contribute nothing to the softmax.
    lane = jax.lax.broadcasted_iota(jnp.int32, logits.shape, dimension=1)
    logits = jnp.where(lane < num_classes, logits, jnp.float32(-1e30))

    # Numerically stable log_softmax along the class axis.
    m = jnp.max(logits, axis=-1, keepdims=True)
    shifted = logits - m
    lse = jnp.log(jnp.sum(jnp.exp(shifted), axis=-1, keepdims=True))
    o_ref[...] = (shifted - lse).astype(o_ref.dtype)


def prepare_params(w1, b1, w2, b2):
    """Zero-pad params to TPU-friendly lane widths (mathematically exact).

    w1: (F, 25) -> (F, 128); b1 -> (1, 128); w2: (25, 3) -> (128, 128);
    b2 -> (1, 128).  Weights are stored as (in, out) so the kernel computes
    x @ W (== x @ W_pt.T for the PyTorch layout)."""
    F, H = w1.shape
    w1p = jnp.zeros((F, H_PAD), jnp.float32).at[:, :H].set(w1)
    b1p = jnp.zeros((1, H_PAD), jnp.float32).at[:, :H].set(b1.reshape(1, -1))
    w2p = jnp.zeros((H_PAD, OUT_PAD), jnp.float32).at[:H, :OUT].set(w2)
    b2p = jnp.zeros((1, OUT_PAD), jnp.float32).at[:, :OUT].set(b2.reshape(1, -1))
    return w1p, b1p, w2p, b2p


def net_forward(x, w1p, b1p, w2p, b2p, *, tb=512, force_pallas=False):
    """x: (B, F) f32, padded params from prepare_params. Returns (B, 3) log-probs."""
    B, F = x.shape

    if B < 512 and not force_pallas:
        # Tiny batches: pallas_call launch + per-step overhead dominates a few
        # hundred FLOPs; the pure-JAX path is strictly faster here.
        h = jnp.maximum(x @ w1p + b1p, 0.0)
        return jax.nn.log_softmax((h @ w2p + b2p)[:, :OUT], axis=1)

    # Batch tile: largest of (tb, whole batch rounded to a sublane multiple).
    TB = min(tb, _round_up(B, 8))
    B_pad = _round_up(B, TB)
    if B_pad != B:
        x = jnp.pad(x, ((0, B_pad - B), (0, 0)))

    grid = (B_pad // TB,)
    kernel = functools.partial(mlp_kernel, num_classes=OUT)

    # Resident weights: constant index_map, block == full array.
    def weight_spec(a):
        return pl.BlockSpec(a.shape, lambda i: (0,) * a.ndim)

    # Advisory cost estimate for XLA scheduling.
    weight_elems = F * H_PAD + H_PAD + H_PAD * OUT_PAD + OUT_PAD
    cost = pl.CostEstimate(
        flops=2 * B_pad * (F * H_PAD + H_PAD * OUT_PAD),
        transcendentals=B_pad * (OUT_PAD + 1),
        bytes_accessed=4 * (B_pad * F + B_pad * OUT_PAD + weight_elems),
    )

    # VMEM budget: double-buffered x + out tiles, (double-buffered) weights,
    # plus headroom; clamp to 64 MiB so it is valid on v7x as well.
    vmem_bytes = 4 * (2 * TB * F + 2 * TB * OUT_PAD + 2 * weight_elems)
    vmem_limit = int(min(max(2 * vmem_bytes + (4 << 20), 16 << 20), 64 << 20))

    out = pl.pallas_call(
        kernel,
        out_shape=jax.ShapeDtypeStruct((B_pad, OUT_PAD), jnp.float32),
        grid=grid,
        in_specs=[
            pl.BlockSpec((TB, F), lambda i: (i, 0)),   # x: batch-tiled
            weight_spec(w1p),
            weight_spec(b1p),
            weight_spec(w2p),
            weight_spec(b2p),
        ],
        out_specs=pl.BlockSpec((TB, OUT_PAD), lambda i: (i, 0)),  # lane-dense
        compiler_params=pltpu.CompilerParams(
            dimension_semantics=("parallel",),
            vmem_limit_bytes=vmem_limit,
        ),
        cost_estimate=cost,
    )(x, w1p, b1p, w2p, b2p)

    return out[:B, :OUT]


def init_params(key, input_size, hidden=HIDDEN, out=OUT):
    """Deterministic init mimicking PyTorch nn.Linear default
    (uniform(-1/sqrt(fan_in), 1/sqrt(fan_in))), stored as (in, out)."""
    k1, k2, k3, k4 = jax.random.split(key, 4)
    bound1 = 1.0 / jnp.sqrt(jnp.float32(input_size))
    bound2 = 1.0 / jnp.sqrt(jnp.float32(hidden))
    w1 = jax.random.uniform(k1, (input_size, hidden), jnp.float32, -bound1, bound1)
    b1 = jax.random.uniform(k2, (1, hidden), jnp.float32, -bound1, bound1)
    w2 = jax.random.uniform(k3, (hidden, out), jnp.float32, -bound2, bound2)
    b2 = jax.random.uniform(k4, (1, out), jnp.float32, -bound2, bound2)
    return w1, b1, w2, b2


def _reference(x, w1, b1, w2, b2):
    h = jnp.maximum(x @ w1 + b1, 0.0)
    return jax.nn.log_softmax(h @ w2 + b2, axis=1)


if __name__ == "__main__":
    key = jax.random.PRNGKey(0)
    k_x, k_x2, k_p = jax.random.split(key, 3)

    input_size = 32
    w1, b1, w2, b2 = init_params(k_p, input_size)
    w1p, b1p, w2p, b2p = prepare_params(w1, b1, w2, b2)

    # Case 1: small batch (as in the original example), force the Pallas path.
    batch = 8
    x = jax.random.normal(k_x, (batch, input_size), jnp.float32)
    out = net_forward(x, w1p, b1p, w2p, b2p, force_pallas=True)
    out = jax.block_until_ready(out)
    ref = _reference(x, w1, b1, w2, b2)
    assert out.shape == (batch, OUT)
    assert jnp.allclose(out, ref, atol=1e-5, rtol=1e-5)

    # Case 2: batch that exercises multi-tile grid + ragged batch padding.
    batch2 = 600
    x2 = jax.random.normal(k_x2, (batch2, input_size), jnp.float32)
    out2 = net_forward(x2, w1p, b1p, w2p, b2p, force_pallas=True)
    out2 = jax.block_until_ready(out2)
    ref2 = _reference(x2, w1, b1, w2, b2)
    assert out2.shape == (batch2, OUT)
    assert jnp.allclose(out2, ref2, atol=1e-5, rtol=1e-5)

    print("KERNEL_OK")
</pallas_src>

<mosaic_0001>
module attributes {stable_mosaic.version = 11 : i64} {
  func.func @mlp_kernel(%arg0: i32, %arg1: memref<8x32xf32, #tpu.memory_space<vmem>>, %arg2: memref<32x128xf32, #tpu.memory_space<vmem>>, %arg3: memref<1x128xf32, #tpu.memory_space<vmem>>, %arg4: memref<128x128xf32, #tpu.memory_space<vmem>>, %arg5: memref<1x128xf32, #tpu.memory_space<vmem>>, %arg6: memref<8x128xf32, #tpu.memory_space<vmem>>) attributes {dimension_semantics = [#tpu.dimension_semantics<parallel>], iteration_bounds = array<i64: 1>, scalar_prefetch = 0 : i64, scratch_operands = 0 : i64, tpu.core_type = #tpu.core_type<tc>, window_params = [{transform_indices = @transform_0, window_bounds = array<i64: 8, 32>}, {pipeline_mode = #tpu.pipeline_mode<synchronous>, transform_indices = @transform_1, window_bounds = array<i64: 32, 128>}, {pipeline_mode = #tpu.pipeline_mode<synchronous>, transform_indices = @transform_2, window_bounds = array<i64: 1, 128>}, {pipeline_mode = #tpu.pipeline_mode<synchronous>, transform_indices = @transform_3, window_bounds = array<i64: 128, 128>}, {pipeline_mode = #tpu.pipeline_mode<synchronous>, transform_indices = @transform_4, window_bounds = array<i64: 1, 128>}, {transform_indices = @transform_5, window_bounds = array<i64: 8, 128>}]} {
    %c0 = arith.constant 0 : index
    %c0_0 = arith.constant 0 : index
    %0 = vector.load %arg1[%c0, %c0_0] : memref<8x32xf32, #tpu.memory_space<vmem>>, vector<8x32xf32>
    %c0_1 = arith.constant 0 : index
    %c0_2 = arith.constant 0 : index
    %1 = vector.load %arg2[%c0_1, %c0_2] : memref<32x128xf32, #tpu.memory_space<vmem>>, vector<32x128xf32>
    %cst = arith.constant dense<0.000000e+00> : vector<8x128xf32>
    %2 = tpu.matmul %0, %1, %cst {dimension_numbers = #tpu.dot_dimension_numbers<[1], [0], [0], [1], [0, 0, 1, 1], [], []>} : vector<8x32xf32>, vector<32x128xf32>, vector<8x128xf32> -> vector<8x128xf32>
    %c0_3 = arith.constant 0 : index
    %c0_4 = arith.constant 0 : index
    %3 = vector.load %arg3[%c0_3, %c0_4] : memref<1x128xf32, #tpu.memory_space<vmem>>, vector<1x128xf32>
    %4 = vector.broadcast %3 : vector<1x128xf32> to vector<8x128xf32>
    %5 = arith.addf %2, %4 : vector<8x128xf32>
    %cst_5 = arith.constant 0.000000e+00 : f32
    %6 = vector.broadcast %cst_5 : f32 to vector<8x128xf32>
    %7 = arith.maximumf %5, %6 : vector<8x128xf32>
    %c0_6 = arith.constant 0 : index
    %c0_7 = arith.constant 0 : index
    %8 = vector.load %arg4[%c0_6, %c0_7] : memref<128x128xf32, #tpu.memory_space<vmem>>, vector<128x128xf32>
    %cst_8 = arith.constant dense<0.000000e+00> : vector<8x128xf32>
    %9 = tpu.matmul %7, %8, %cst_8 {dimension_numbers = #tpu.dot_dimension_numbers<[1], [0], [0], [1], [0, 0, 1, 1], [], []>} : vector<8x128xf32>, vector<128x128xf32>, vector<8x128xf32> -> vector<8x128xf32>
    %c0_9 = arith.constant 0 : index
    %c0_10 = arith.constant 0 : index
    %10 = vector.load %arg5[%c0_9, %c0_10] : memref<1x128xf32, #tpu.memory_space<vmem>>, vector<1x128xf32>
    %11 = vector.broadcast %10 : vector<1x128xf32> to vector<8x128xf32>
    %12 = arith.addf %9, %11 : vector<8x128xf32>
    %13 = tpu.iota {dimensions = array<i32: 1>} : vector<8x128xi32>
    %c3_i32 = arith.constant 3 : i32
    %14 = vector.broadcast %c3_i32 : i32 to vector<8x128xi32>
    %15 = arith.cmpi slt, %13, %14 : vector<8x128xi32>
    %cst_11 = arith.constant -1.000000e+30 : f32
    %16 = vector.broadcast %cst_11 : f32 to vector<8x128xf32>
    %17 = arith.select %15, %12, %16 : vector<8x128xi1>, vector<8x128xf32>
    %cst_12 = arith.constant dense<0xFF800000> : vector<8xf32>
    %18 = vector.multi_reduction <maximumf>, %17, %cst_12 [1] : vector<8x128xf32> to vector<8xf32>
    %19 = vector.shape_cast %18 : vector<8xf32> to vector<8x1xf32>
    %20 = vector.broadcast %19 : vector<8x1xf32> to vector<8x128xf32>
    %21 = arith.subf %17, %20 : vector<8x128xf32>
    %22 = math.exp %21 : vector<8x128xf32>
    %cst_13 = arith.constant dense<0.000000e+00> : vector<8xf32>
    %23 = vector.multi_reduction <add>, %22, %cst_13 [1] : vector<8x128xf32> to vector<8xf32>
    %24 = vector.shape_cast %23 : vector<8xf32> to vector<8x1xf32>
    %25 = math.log %24 : vector<8x1xf32>
    %26 = vector.broadcast %25 : vector<8x1xf32> to vector<8x128xf32>
    %27 = arith.subf %21, %26 : vector<8x128xf32>
    %c0_14 = arith.constant 0 : index
    %c0_15 = arith.constant 0 : index
    %28 = vector.load %arg6[%c0_14, %c0_15] : memref<8x128xf32, #tpu.memory_space<vmem>>, vector<8x128xf32>
    tpu.vector_store %arg6[%c0_14, %c0_15], %27 {strides = array<i32>} : memref<8x128xf32, #tpu.memory_space<vmem>>, vector<8x128xf32>,
    return
  }
  func.func @transform_0(%arg0: i32) -> (i32, i32) {
    %c0_i32 = arith.constant 0 : i32
    %c0_i32_0 = arith.constant 0 : i32
    return %arg0, %c0_i32 : i32, i32
  }
  func.func @transform_1(%arg0: i32) -> (i32, i32) {
    %c0_i32 = arith.constant 0 : i32
    %c0_i32_0 = arith.constant 0 : i32
    %c0_i32_1 = arith.constant 0 : i32
    return %c0_i32, %c0_i32_0 : i32, i32
  }
  func.func @transform_2(%arg0: i32) -> (i32, i32) {
    %c0_i32 = arith.constant 0 : i32
    %c0_i32_0 = arith.constant 0 : i32
    %c0_i32_1 = arith.constant 0 : i32
    return %c0_i32, %c0_i32_0 : i32, i32
  }
  func.func @transform_3(%arg0: i32) -> (i32, i32) {
    %c0_i32 = arith.constant 0 : i32
    %c0_i32_0 = arith.constant 0 : i32
    %c0_i32_1 = arith.constant 0 : i32
    return %c0_i32, %c0_i32_0 : i32, i32
  }
  func.func @transform_4(%arg0: i32) -> (i32, i32) {
    %c0_i32 = arith.constant 0 : i32
    %c0_i32_0 = arith.constant 0 : i32
    %c0_i32_1 = arith.constant 0 : i32
    return %c0_i32, %c0_i32_0 : i32, i32
  }
  func.func @transform_5(%arg0: i32) -> (i32, i32) {
    %c0_i32 = arith.constant 0 : i32
    %c0_i32_0 = arith.constant 0 : i32
    return %arg0, %c0_i32 : i32, i32
  }
}

</mosaic_0001>

<bundles_post_ra>
// kernel: tpu_custom_call.1
= control target key start
LH: loop header
LB: loop body
LE: loop exit
PB: predicated region body
PF: predicated region fallthrough
CT: control target
= control target key end

     0   :  { %10 = vsyncpa [#allocation3], 0  ;;  %s578_s0 = inlined_call_operand.hbm [shape: f32[8,32], index: 0, kind: input, shape index: {}]   ;;  %s579_s1 = inlined_call_operand.hbm [shape: f32[32,128], index: 1, kind: input, shape index: {}]   ;;  %s580_s2 = inlined_call_operand.vmem [shape: f32[1,128], index: 2, kind: input, shape index: {}]   ;;  %s581_s3 = inlined_call_operand.hbm [shape: f32[128,128], index: 3, kind: input, shape index: {}]   ;;  %s582_s4 = inlined_call_operand.vmem [shape: f32[1,128], index: 4, kind: input, shape index: {}]   ;;  %s583_s5 = inlined_call_operand.hbm [shape: f32[8,128], index: 5, kind: output, shape index: {}]  }
   0x1   :  { %11 = vsyncpa [#allocation6], 0 }
   0x2   :  { %12 = vsyncpa [#allocation4], 0  ;;  %s479_s18 = smov [#allocation5]   ;;  %s385_s22 = scalar_lea.hbm %s579_s1, 512 }
   0x3   :  { %s28_s19 = sshll.u32 %s479_s18, 4  ;;  %p386_p0 = scmp.ne.s32.totalorder %s579_s1, %s385_s22  ;;  %s29_s19 = int_to_ptr.vmem [resolvable:$true] %s28_s19 }
   0x4   :  { %p389_p1 = scmp.lt.u32.totalorder %s385_s22, %s579_s1 }
   0x6   :  { %p391_p2 = pnand %p389_p1, %p386_p0 }
   0x8   :  { %394 = shalt.err (!%p391_p2)
}
   0x9   :  { %s395_s27 = scalar_lea.vmem %s29_s19, 512  ;;  %p400_p4 = scmp.lt.s32.totalorder %s29_s19, %s29_s19 }
   0xa   :  { %p396_p3 = scmp.ne.s32.totalorder %s29_s19, %s395_s27  ;;  %p401_p5 = scmp.lt.s32.totalorder %s395_s27, %s395_s27 }
   0xc   :  { %p402_p6 = por %p401_p5, %p400_p4 }
   0xe   :  { %p403_p7 = pnand %p402_p6, %p396_p3 }
  0x10   :  { %406 = shalt.err (!%p403_p7)
}
  0x11   :  { %s480_s28 = smov 128   ;;  %s481_s29 = smov 8  }
  0x12   :  { %34 = dma.hbm_to_vmem [thread:$0]  %s579_s1, 512, %s29_s19, [#allocation6], %s480_s28, %s480_s28, %s481_s29  }
  0x13   :  { %s482_s7 = smov [#allocation2]   ;;  %s483_s9 = smov [#allocation7]  }
  0x14   :  { %s19_s8 = sshll.u32 %s482_s7, 4  ;;  %s42_s10 = sshll.u32 %s483_s9, 4  ;;  %s20_s8 = int_to_ptr.vmem [resolvable:$true] %s19_s8  ;;  %s43_s10 = int_to_ptr.vmem [resolvable:$true] %s42_s10 }
  0x15   :  { %s407_s13 = scalar_lea.hbm %s578_s0, 128 }
  0x16   :  { %p408_p8 = scmp.ne.s32.totalorder %s578_s0, %s407_s13  ;;  %p411_p9 = scmp.lt.u32.totalorder %s407_s13, %s578_s0 }
  0x18   :  { %p413_p10 = pnand %p411_p9, %p408_p8 }
  0x1a   :  { %416 = shalt.err (!%p413_p10)
}
  0x1b   :  { %s417_s1 = scalar_lea.vmem %s20_s8, 128  ;;  %p422_p12 = scmp.lt.s32.totalorder %s20_s8, %s20_s8 }
  0x1c   :  { %p418_p11 = scmp.ne.s32.totalorder %s20_s8, %s417_s1  ;;  %p423_p13 = scmp.lt.s32.totalorder %s417_s1, %s417_s1 }
  0x1e   :  { %p424_p0 = por %p423_p13, %p422_p12 }
  0x20   :  { %p425_p1 = pnand %p424_p0, %p418_p11 }
  0x22   :  { %428 = shalt.err (!%p425_p1)
}
  0x23   :  { %22 = dma.hbm_to_vmem [thread:$0]  %s578_s0, 128, %s20_s8, [#allocation3]  }
  0x24   :  { %s429_s22 = scalar_lea.hbm %s581_s3, 2048 }
  0x25   :  { %p430_p2 = scmp.ne.s32.totalorder %s581_s3, %s429_s22  ;;  %p433_p3 = scmp.lt.u32.totalorder %s429_s22, %s581_s3 }
  0x27   :  { %p435_p4 = pnand %p433_p3, %p430_p2 }
  0x29   :  { %438 = shalt.err (!%p435_p4)
}
  0x2a   :  { %s439_s27 = scalar_lea.vmem %s43_s10, 2048  ;;  %p444_p6 = scmp.lt.s32.totalorder %s43_s10, %s43_s10 }
  0x2b   :  { %p440_p5 = scmp.ne.s32.totalorder %s43_s10, %s439_s27  ;;  %p445_p7 = scmp.lt.s32.totalorder %s439_s27, %s439_s27 }
  0x2d   :  { %p446_p8 = por %p445_p7, %p444_p6 }
  0x2f   :  { %p447_p9 = pnand %p446_p8, %p440_p5 }
  0x31   :  { %450 = shalt.err (!%p447_p9)
}
  0x32   :  { %48 = dma.hbm_to_vmem [thread:$0]  %s581_s3, 2048, %s43_s10, [#allocation6], %s480_s28, %s480_s28, %s481_s29  }
  0x33   :  { %473 = dma.done.wait [#allocation3], 128  }
  0x34   :  { %474 = vsyncadd [#allocation3], 4294967168 }
  0x35   :  { %475 = dma.done.wait [#allocation6], 2560  }
  0x36   :  { %476 = vsyncadd [#allocation6], 4294964736  ;;  %v484_v0 = vmov 0.0|0.0   ;;  %vm485_vm0 = vmmov 0   ;;  %v486_v1 = vmov 0.0   ;;  %v61_v2 = vld [vmem:[#allocation5] sm:$0xff]  ;;  %v240_v38 = vlaneseq }
  0x37   :  { %342 = vmatprep.subr.bf16.mxu0 %v484_v0  ;;  %304 = vmatprep.mubr.msk.f32.mxu0 %vm485_vm0, %v486_v1  ;;  %v62_v3 = vld [vmem:[#allocation5 + $0x8] sm:$0xff]  ;;  %v63_v4 = vld [vmem:[#allocation5 + $0x10] sm:$0xff]  ;;  %v64_v6 = vld [vmem:[#allocation5 + $0x18] sm:$0xff]  ;;  %vm72_vm1 = vcmask 261120  }
  0x38   :  { %348 = vmatprep.subr.bf16.mxu1 %v484_v0  ;;  %339 = vmatprep.mubr.msk.f32.mxu1 %vm485_vm0, %v486_v1  ;;  %v343_v5 = vpack.c.bf16 %v62_v3, %v61_v2  ;;  %v147_v7 = vld [vmem:[#allocation7] sm:$0xff]  ;;  %v148_v8 = vld [vmem:[#allocation7 + $0x8] sm:$0xff]  ;;  %v149_v9 = vld [vmem:[#allocation7 + $0x10] sm:$0xff]  ;;  %v346_v11 = vpack.c.bf16 %v64_v6, %v63_v4  ;;  %v241_v39 = vand.u32 127, %v240_v38 }
  0x39   :  { %v150_v10 = vld [vmem:[#allocation7 + $0x18] sm:$0xff]  ;;  %v349_v12 = vpack.c.bf16 %v148_v8, %v147_v7  ;;  %v151_v14 = vld [vmem:[#allocation7 + $0x20] sm:$0xff]  ;;  %v152_v15 = vld [vmem:[#allocation7 + $0x28] sm:$0xff] }
  0x3a   :  { %344 = vmatpush3.bf16.msra.mxu0 %v343_v5  ;;  %v352_v13 = vpack.c.bf16 %v150_v10, %v149_v9  ;;  %v60_v16 = vld [vmem:[#allocation2] sm:$0xff]  ;;  %v355_v17 = vpack.c.bf16 %v152_v15, %v151_v14  ;;  %v153_v18 = vld [vmem:[#allocation7 + $0x30] sm:$0xff]  ;;  %v155_v21 = vld [vmem:[#allocation7 + $0x40] sm:$0xff]  ;;  %vm242_vm2 = vcmp.lt.s32.totalorder %v241_v39, 3 }
  0x3b   :  { %345 = vmatprep.subr.bf16.mxu0 %v484_v0  ;;  %350 = vmatpush3.bf16.msra.mxu1 %v349_v12  ;;  %v154_v19 = vld [vmem:[#allocation7 + $0x38] sm:$0xff]  ;;  %v156_v22 = vld [vmem:[#allocation7 + $0x48] sm:$0xff]  ;;  %v157_v24 = vld [vmem:[#allocation7 + $0x50] sm:$0xff] }
  0x3c   :  { %351 = vmatprep.subr.bf16.mxu1 %v484_v0  ;;  %v358_v20 = vpack.c.bf16 %v154_v19, %v153_v18  ;;  %v361_v23 = vpack.c.bf16 %v156_v22, %v155_v21  ;;  %v158_v25 = vld [vmem:[#allocation7 + $0x58] sm:$0xff]  ;;  %v159_v27 = vld [vmem:[#allocation7 + $0x60] sm:$0xff]  ;;  %v160_v28 = vld [vmem:[#allocation7 + $0x68] sm:$0xff] }
  0x3d   :  { %v364_v26 = vpack.c.bf16 %v158_v25, %v157_v24  ;;  %v367_v29 = vpack.c.bf16 %v160_v28, %v159_v27  ;;  %v161_v30 = vld [vmem:[#allocation7 + $0x70] sm:$0xff]  ;;  %v162_v31 = vld [vmem:[#allocation7 + $0x78] sm:$0xff] }
  0x3e   :  { %347 = vmatpush3.bf16.msra.mxu0 %v346_v11  ;;  %v370_v32 = vpack.c.bf16 %v162_v31, %v161_v30  ;;  %v271_v33 = vld [vmem:[%s580_s2] ss:$0 sm:$0xff]  ;;  %s487_s2 = smov [#allocation8]  }
  0x3f   :  { %353 = vmatpush3.bf16.msra.mxu1 %v352_v13  ;;  %v273_v40 = vld [vmem:[%s582_s4] ss:$0 sm:$0xff]  ;;  %s261_s7 = sshll.u32 %s487_s2, 4  ;;  %s262_s7 = int_to_ptr.vmem [resolvable:$true] %s261_s7 }
  0x40   :  { %354 = vmatprep.subr.bf16.mxu1 %v484_v0  ;;  %s451_s4 = scalar_lea.vmem %s262_s7, 128  ;;  %p456_p11 = scmp.lt.s32.totalorder %s262_s7, %s262_s7 }
  0x41   :  { %305 = vmatmul.mubr.msk.f32.vlgmr.msra.gmra.mrb[0].mxu0 %vm72_vm1, %v60_v16  ;;  %p452_p10 = scmp.ne.s32.totalorder %s262_s7, %s451_s4  ;;  %p457_p12 = scmp.lt.s32.totalorder %s451_s4, %s451_s4 }
  0x43   :  { %356 = vmatpush3.bf16.msra.mxu1 %v355_v17  ;;  %p458_p13 = por %p457_p12, %p456_p11 }
  0x44   :  { %357 = vmatprep.subr.bf16.mxu1 %v484_v0 }
  0x45   :  { %p459_p0 = pnand %p458_p13, %p452_p10 }
  0x47   :  { %359 = vmatpush3.bf16.msra.mxu1 %v358_v20 }
  0x48   :  { %360 = vmatprep.subr.bf16.mxu1 %v484_v0 }
  0x4b   :  { %362 = vmatpush3.bf16.msra.mxu1 %v361_v23 }
  0x4c   :  { %363 = vmatprep.subr.bf16.mxu1 %v484_v0 }
  0x4f   :  { %365 = vmatpush3.bf16.msra.mxu1 %v364_v26 }
  0x50   :  { %366 = vmatprep.subr.bf16.mxu1 %v484_v0 }
  0x53   :  { %368 = vmatpush3.bf16.msra.mxu1 %v367_v29 }
  0x54   :  { %369 = vmatprep.subr.bf16.mxu1 %v484_v0 }
  0x57   :  { %371 = vmatpush3.bf16.msra.mxu1 %v370_v32 }
 0x114   :  { %v142_v34 = vpop.f32.mrb[0].mxu0 }
 0x115   :  { %v143_v35 = vadd.f32 %v271_v33, %v142_v34  ;;  %v306_v36 = vpop.f32.mrb[1].mxu0 }
 0x117   :  { %v146_v37 = vmax.f32 %v143_v35, 0.0 }
 0x119   :  { %340 = vmatmul.mubr.f32.vlgmr.msra.gmra.mrb[0].mxu1 %v146_v37 }
 0x1ec   :  { %v236_v41 = vpop.f32.mrb[0].mxu1 }
 0x1ed   :  { %v237_v42 = vadd.f32 %v273_v40, %v236_v41  ;;  %v341_v43 = vpop.f32.mrb[1].mxu1 }
 0x1ef   :  { %v243_v44 = vsel %vm242_vm2, %v237_v42, -1e+30 }
 0x1f0   :  { %244 = vmax.xlane.f32.xlu0 %v243_v44 }
 0x27d   :  { %v245_v45 = vpop.xlane.xlu0 %244 }
 0x27e   :  { %v246_v46 = vsub.f32 %v243_v44, %v245_v45 }
 0x280   :  { %v247_v47 = vmul.f32 1.442695, %v246_v46 }
 0x282   :  { %381 = vpow2.f32 %v247_v47 }
 0x28c   :  { %v382_v48 = vpop.eup %381 }
 0x28d   :  { %249 = vadd.xlane.f32.xlu0 %v382_v48 }
 0x31a   :  { %v250_v49 = vpop.xlane.xlu0 %249 }
 0x31b   :  { %383 = vlog2.f32 %v250_v49 }
 0x325   :  { %v384_v50 = vpop.eup %383 }
 0x326   :  { %v252_v51 = vmul.f32 0.6931472, %v384_v50 }
 0x328   :  { %v253_v52 = vsub.f32 %v246_v46, %v252_v51 }
 0x32a   :  { %254 = vst [vmem:[#allocation8] sm:$0xff] %v253_v52 }
 0x32b   :  { %462 = shalt.err (!%p459_p0)
}
 0x32c   :  { %s463_s10 = scalar_lea.hbm %s583_s5, 128 }
 0x32d   :  { %p464_p1 = scmp.ne.s32.totalorder %s583_s5, %s463_s10  ;;  %p467_p2 = scmp.lt.u32.totalorder %s463_s10, %s583_s5 }
 0x32f   :  { %p469_p3 = pnand %p467_p2, %p464_p1 }
 0x331   :  { %472 = shalt.err (!%p469_p3)
}
 0x332   :  { %264 = dma.vmem_to_hbm [thread:$0]  %s262_s7, 128, %s583_s5, [#allocation4]  }
 0x333   :  { %477 = dma.done.wait [#allocation4], 128  }
 0x334   :  { %478 = vsyncadd [#allocation4], 4294967168 }
 0x335   :  { %268 = vsyncpa [#allocation3], 1 }
 0x336   :  { %269 = vsyncpa [#allocation6], 1 }
 0x337   :  { %270 = vsyncpa [#allocation4], 1 }

</bundles_post_ra>
